<compile_context>
chip_gen: v5e
topology: v5e:2x2
jax: 0.10.0
libtpu: 0.0.40
codegen_flags: <defaults>
</compile_context>

<pallas_src>
import math
import functools

import jax
import jax.numpy as jnp
from jax import lax
from jax.experimental import pallas as pl
from jax.experimental.pallas import tpu as pltpu


_MAX_TM = 512
_MAX_TN = 512
_MAX_TK = 1024
_LANE = 128


def _round_up(x, m):
    return ((x + m - 1) // m) * m


def _sublane(dtype):
    """Minimum second-to-last-dim tile multiple for a dtype (8/16/32)."""
    return max(8, 32 // jnp.dtype(dtype).itemsize)


def _choose_tile(dim, align, max_tile):
    """Tile size: multiple of `align`, <= max_tile, minimizing padding of
    `dim` while keeping the per-axis block count modest (<= ~8 blocks), so
    non-power-of-two layer shapes are not blown up by 20-60% padding."""
    dim_r = _round_up(dim, align)
    if dim_r <= max_tile:
        return dim_r
    floor = min(_round_up(max(align, dim_r // 8), align), max_tile)
    best_t, best_pad = None, None
    t = floor
    while t <= max_tile:
        pad = _round_up(dim_r, t) - dim_r
        if best_pad is None or pad < best_pad or (pad == best_pad and t > best_t):
            best_t, best_pad = t, pad
        t += align
    return best_t


def _vmem_cap_bytes():
    """Physical VMEM per TensorCore (generation-aware), safe fallback 64 MiB."""
    try:
        cap = int(pltpu.get_tpu_info().vmem_capacity_bytes)
        if cap > 0:
            return cap
    except Exception:
        pass
    return 64 << 20  # v7x-sized fallback: safe on every generation


def _linear_kernel_out_acc(x_ref, w_ref, b_ref, o_ref):
    """f32 output path: accumulate directly into the resident output block
    (block index (i, j) is constant across the K axis -> no scratch needed)."""
    k = pl.program_id(2)

    @pl.when(k == 0)
    def _():
        o_ref[...] = jnp.zeros_like(o_ref)

    # x(tm,tk) . W(tn,tk)^T on the MXU, f32 accumulation.  W stays in its
    # natural (N, K) layout; the transposed contraction is done in-kernel.
    o_ref[...] += lax.dot_general(
        x_ref[...], w_ref[...],
        dimension_numbers=(((1,), (1,)), ((), ())),
        preferred_element_type=jnp.float32)

    @pl.when(k == pl.num_programs(2) - 1)
    def _():
        o_ref[...] += b_ref[...].astype(o_ref.dtype)   # (1,tn) broadcasts over rows


def _linear_kernel_scratch_acc(x_ref, w_ref, b_ref, o_ref, acc_ref):
    """Narrow-output path (e.g. bf16): f32 scratch accumulator, cast at the end."""
    k = pl.program_id(2)

    @pl.when(k == 0)
    def _():
        acc_ref[...] = jnp.zeros_like(acc_ref)

    acc_ref[...] += lax.dot_general(
        x_ref[...], w_ref[...],
        dimension_numbers=(((1,), (1,)), ((), ())),
        preferred_element_type=jnp.float32)

    @pl.when(k == pl.num_programs(2) - 1)
    def _():
        o_ref[...] = (acc_ref[...] + b_ref[...].astype(jnp.float32)).astype(o_ref.dtype)


def linear_reshaped_pallas(x, weight, bias, out_features, in_features,
                           tm=None, tn=None, tk=None):
    """y = x @ weight.view(out, in).T + bias  (weight may be stored reshaped)."""
    orig_shape = x.shape
    assert orig_shape[-1] == in_features
    x2d = x.reshape(-1, in_features)
    M, K = x2d.shape
    N = out_features
    out_dtype = x.dtype

    # Logical (N, K) view of the stored (possibly reshaped) weight — reshape
    # only, no transpose / extra HBM pass.
    w2d = weight.reshape(out_features, in_features)
    if bias is None:
        bias = jnp.zeros((out_features,), dtype=out_dtype)
    b2d = bias.reshape(1, out_features)

    x_bytes = x2d.dtype.itemsize
    w_bytes = w2d.dtype.itemsize
    b_bytes = b2d.dtype.itemsize
    out_bytes = jnp.dtype(out_dtype).itemsize
    acc_in_out = (jnp.dtype(out_dtype) == jnp.dtype(jnp.float32))

    sub = _sublane(x2d.dtype)              # dtype-aware sublane alignment
    vmem_cap = _vmem_cap_bytes()
    vmem_usable = int(0.75 * vmem_cap)     # ~48 MiB on v7x, ~96 MiB on v5e/v6e

    def working_set(tm_, tn_, tk_):
        est = (2 * tm_ * tk_ * x_bytes       # x, double-buffered
               + 2 * tn_ * tk_ * w_bytes     # W, double-buffered
               + 2 * tm_ * tn_ * out_bytes   # out, double-buffered
               + 2 * tn_ * b_bytes)          # bias
        if not acc_in_out:
            est += tm_ * tn_ * 4             # f32 scratch accumulator
        return est

    # ---- tile selection ----------------------------------------------------
    Nr = _round_up(N, _LANE)
    Kr = _round_up(K, _LANE)
    tm = tm or _choose_tile(M, sub, _MAX_TM)

    if tn is None or tk is None:
        # Weight-resident fast path: whole (rounded) W + per-step working set
        # fits in VMEM -> single N/K blocks; W block index is constant over the
        # grid, so W is DMA'd exactly once instead of re-streamed per M block.
        if working_set(tm, Nr, Kr) <= vmem_usable:
            tn = tn or Nr
            tk = tk or Kr
        else:
            tn = tn or _choose_tile(N, _LANE, _MAX_TN)
            tk = tk or _choose_tile(K, _LANE, _MAX_TK)

    Mp = _round_up(M, tm)
    Np = _round_up(N, tn)
    Kp = _round_up(K, tk)

    # Give v7x's second TensorCore something to shard when the whole problem
    # would otherwise be a single grid step (harmless on single-core chips).
    if Mp // tm == 1 and Np // tn == 1 and Kp // tk == 1 and tm >= 2 * sub:
        tm = _round_up((tm + 1) // 2, sub)
        Mp = _round_up(M, tm)

    # ---- pad to tile multiples: no-ops when tiles divide the shapes (which
    # the tile chooser arranges for); zero-padded K is accumulation-safe ------
    if (Mp, Kp) != (M, K):
        x2d = jnp.pad(x2d, ((0, Mp - M), (0, Kp - K)))
    if (Np, Kp) != (N, K):
        w2d = jnp.pad(w2d, ((0, Np - N), (0, Kp - K)))
    if Np != N:
        b2d = jnp.pad(b2d, ((0, 0), (0, Np - N)))

    grid = (Mp // tm, Np // tn, Kp // tk)
    gi, gj, gk = grid

    # ---- compiler hints ------------------------------------------------------
    # Bytes accessed including grid re-streaming (consecutive-step DMA dedup).
    x_reads = 1 if gk == 1 else gj
    w_reads = 1 if (gj == 1 and gk == 1) else gi
    cost = pl.CostEstimate(
        flops=2 * Mp * Np * Kp,
        transcendentals=0,
        bytes_accessed=(Mp * Kp * x_bytes * x_reads
                        + Np * Kp * w_bytes * w_reads
                        + Mp * Np * out_bytes
                        + Np * b_bytes),
    )
    vmem_limit = int(min(max(working_set(tm, tn, tk) + (16 << 20), 32 << 20),
                         vmem_cap - (8 << 20)))

    kernel = _linear_kernel_out_acc if acc_in_out else _linear_kernel_scratch_acc
    scratch = [] if acc_in_out else [pltpu.VMEM((tm, tn), jnp.float32)]

    out2d = pl.pallas_call(
        kernel,
        out_shape=jax.ShapeDtypeStruct((Mp, Np), out_dtype),
        grid_spec=pltpu.PrefetchScalarGridSpec(
            num_scalar_prefetch=0,
            grid=grid,
            in_specs=[
                pl.BlockSpec((tm, tk), lambda i, j, k: (i, k)),   # x tile
                pl.BlockSpec((tn, tk), lambda i, j, k: (j, k)),   # W tile (N, K)
                pl.BlockSpec((1, tn), lambda i, j, k: (0, j)),    # bias tile
            ],
            out_specs=pl.BlockSpec((tm, tn), lambda i, j, k: (i, j)),
            scratch_shapes=scratch,
        ),
        compiler_params=pltpu.CompilerParams(
            dimension_semantics=("parallel", "parallel", "arbitrary"),
            vmem_limit_bytes=vmem_limit,
        ),
        cost_estimate=cost,
    )(x2d, w2d, b2d)

    out2d = out2d[:M, :N]
    return out2d.reshape(*orig_shape[:-1], out_features)


def init_linear_reshaped_params(key, in_features, out_features,
                                weight_reshape=None, dtype=jnp.float32):
    """Deterministic re-implementation of LinearReshaped.reset_parameters()."""
    if weight_reshape is None:
        weight_reshape = (out_features, in_features)
    assert in_features * out_features == math.prod(weight_reshape)

    kw, kb = jax.random.split(key)
    bound_w = 1.0 / math.sqrt(in_features)
    weight = jax.random.uniform(
        kw, weight_reshape, dtype=dtype, minval=-bound_w, maxval=bound_w
    )
    # fan_in of the *stored* (possibly reshaped) weight tensor, as PyTorch does.
    fan_in = weight_reshape[-1] if len(weight_reshape) >= 2 else weight_reshape[0]
    bound_b = 1.0 / math.sqrt(fan_in) if fan_in > 0 else 0.0
    bias = jax.random.uniform(
        kb, (out_features,), dtype=dtype, minval=-bound_b, maxval=bound_b
    )
    return weight, bias


if __name__ == "__main__":
    key = jax.random.PRNGKey(0)

    # --- Test 1: small ViT-like shapes with a reshaped stored weight. --------
    batch, seq = 2, 8
    in_features, out_features = 32, 64
    weight_reshape = (8, 256)   # stored layout differs from (out, in)

    kx, kp, k2 = jax.random.split(key, 3)
    x = jax.random.normal(kx, (batch, seq, in_features), dtype=jnp.float32)
    weight, bias = init_linear_reshaped_params(
        kp, in_features, out_features, weight_reshape=weight_reshape
    )

    fn = jax.jit(
        functools.partial(
            linear_reshaped_pallas,
            out_features=out_features,
            in_features=in_features,
        )
    )
    y = fn(x, weight, bias)
    jax.block_until_ready(y)

    y_ref = x @ weight.reshape(out_features, in_features).T + bias
    assert y.shape == (batch, seq, out_features)
    assert jnp.allclose(y, y_ref, atol=1e-5, rtol=1e-5)

    # --- Test 2: multi-block M grid + weight-resident path (no padding). -----
    b2, s2, in2, out2 = 2, 520, 640, 384
    kx2, kp2 = jax.random.split(k2)
    x2 = jax.random.normal(kx2, (b2, s2, in2), dtype=jnp.float32)
    w2, bi2 = init_linear_reshaped_params(kp2, in2, out2)

    fn2 = jax.jit(
        functools.partial(
            linear_reshaped_pallas, out_features=out2, in_features=in2
        )
    )
    y2 = fn2(x2, w2, bi2)
    jax.block_until_ready(y2)

    y2_ref = x2 @ w2.reshape(out2, in2).T + bi2
    assert y2.shape == (b2, s2, out2)
    assert jnp.allclose(y2, y2_ref, atol=1e-4, rtol=1e-4)

    # --- Test 3: bf16 inputs exercise dtype-aware tiling + scratch-acc path. -
    xb = x2.astype(jnp.bfloat16)
    wb = w2.astype(jnp.bfloat16)
    bb = bi2.astype(jnp.bfloat16)
    y3 = jax.jit(
        functools.partial(linear_reshaped_pallas, out_features=out2, in_features=in2)
    )(xb, wb, bb)
    jax.block_until_ready(y3)
    y3_ref = (xb.astype(jnp.float32) @ wb.reshape(out2, in2).T.astype(jnp.float32)
              + bb.astype(jnp.float32))
    assert y3.shape == (b2, s2, out2)
    assert jnp.allclose(y3.astype(jnp.float32), y3_ref, atol=2e-1, rtol=2e-2)

    print("KERNEL_OK")
</pallas_src>

<mosaic_0001>
module attributes {stable_mosaic.version = 11 : i64} {
  func.func @_linear_kernel_out_acc(%arg0: i32, %arg1: i32, %arg2: i32, %arg3: memref<8x128xf32, #tpu.memory_space<vmem>>, %arg4: memref<128x128xf32, #tpu.memory_space<vmem>>, %arg5: memref<1x128xf32, #tpu.memory_space<vmem>>, %arg6: memref<8x128xf32, #tpu.memory_space<vmem>>) attributes {dimension_semantics = [#tpu.dimension_semantics<parallel>, #tpu.dimension_semantics<parallel>, #tpu.dimension_semantics<arbitrary>], iteration_bounds = array<i64: 2, 1, 1>, scalar_prefetch = 0 : i64, scratch_operands = 0 : i64, tpu.core_type = #tpu.core_type<tc>, window_params = [{transform_indices = @transform_0, window_bounds = array<i64: 8, 128>}, {transform_indices = @transform_1, window_bounds = array<i64: 128, 128>}, {transform_indices = @transform_2, window_bounds = array<i64: 1, 128>}, {transform_indices = @transform_3, window_bounds = array<i64: 8, 128>}]} {
    %c0_i32 = arith.constant 0 : i32
    %0 = arith.cmpi eq, %arg2, %c0_i32 : i32
    %1 = arith.extui %0 : i1 to i32
    %c0_i32_0 = arith.constant 0 : i32
    %2 = arith.cmpi ne, %1, %c0_i32_0 : i32
    scf.if %2 {
      %cst_10 = arith.constant 0.000000e+00 : f32
      %12 = vector.broadcast %cst_10 : f32 to vector<8x128xf32>
      %c0_11 = arith.constant 0 : index
      %c0_12 = arith.constant 0 : index
      %13 = vector.load %arg6[%c0_11, %c0_12] : memref<8x128xf32, #tpu.memory_space<vmem>>, vector<8x128xf32>
      tpu.vector_store %arg6[%c0_11, %c0_12], %12 {strides = array<i32>} : memref<8x128xf32, #tpu.memory_space<vmem>>, vector<8x128xf32>,
    } else {
    }
    %c0 = arith.constant 0 : index
    %c0_1 = arith.constant 0 : index
    %3 = vector.load %arg6[%c0, %c0_1] : memref<8x128xf32, #tpu.memory_space<vmem>>, vector<8x128xf32>
    %c0_2 = arith.constant 0 : index
    %c0_3 = arith.constant 0 : index
    %4 = vector.load %arg3[%c0_2, %c0_3] : memref<8x128xf32, #tpu.memory_space<vmem>>, vector<8x128xf32>
    %c0_4 = arith.constant 0 : index
    %c0_5 = arith.constant 0 : index
    %5 = vector.load %arg4[%c0_4, %c0_5] : memref<128x128xf32, #tpu.memory_space<vmem>>, vector<128x128xf32>
    %cst = arith.constant dense<0.000000e+00> : vector<8x128xf32>
    %6 = tpu.matmul %4, %5, %cst {dimension_numbers = #tpu.dot_dimension_numbers<[1], [1], [0], [0], [0, 0, 1, 0], [], []>} : vector<8x128xf32>, vector<128x128xf32>, vector<8x128xf32> -> vector<8x128xf32>
    %7 = arith.addf %3, %6 : vector<8x128xf32>
    %c0_6 = arith.constant 0 : index
    %c0_7 = arith.constant 0 : index
    %8 = vector.load %arg6[%c0_6, %c0_7] : memref<8x128xf32, #tpu.memory_space<vmem>>, vector<8x128xf32>
    tpu.vector_store %arg6[%c0_6, %c0_7], %7 {strides = array<i32>} : memref<8x128xf32, #tpu.memory_space<vmem>>, vector<8x128xf32>,
    %c0_i32_8 = arith.constant 0 : i32
    %9 = arith.cmpi eq, %arg2, %c0_i32_8 : i32
    %10 = arith.extui %9 : i1 to i32
    %c0_i32_9 = arith.constant 0 : i32
    %11 = arith.cmpi ne, %10, %c0_i32_9 : i32
    scf.if %11 {
      %c0_10 = arith.constant 0 : index
      %c0_11 = arith.constant 0 : index
      %12 = vector.load %arg6[%c0_10, %c0_11] : memref<8x128xf32, #tpu.memory_space<vmem>>, vector<8x128xf32>
      %c0_12 = arith.constant 0 : index
      %c0_13 = arith.constant 0 : index
      %13 = vector.load %arg5[%c0_12, %c0_13] : memref<1x128xf32, #tpu.memory_space<vmem>>, vector<1x128xf32>
      %14 = vector.broadcast %13 : vector<1x128xf32> to vector<8x128xf32>
      %15 = arith.addf %12, %14 : vector<8x128xf32>
      %c0_14 = arith.constant 0 : index
      %c0_15 = arith.constant 0 : index
      %16 = vector.load %arg6[%c0_14, %c0_15] : memref<8x128xf32, #tpu.memory_space<vmem>>, vector<8x128xf32>
      tpu.vector_store %arg6[%c0_14, %c0_15], %15 {strides = array<i32>} : memref<8x128xf32, #tpu.memory_space<vmem>>, vector<8x128xf32>,
    } else {
    }
    return
  }
  func.func @transform_0(%arg0: i32, %arg1: i32, %arg2: i32) -> (i32, i32) {
    %c0_i32 = arith.constant 0 : i32
    return %arg0, %arg2 : i32, i32
  }
  func.func @transform_1(%arg0: i32, %arg1: i32, %arg2: i32) -> (i32, i32) {
    %c0_i32 = arith.constant 0 : i32
    return %arg1, %arg2 : i32, i32
  }
  func.func @transform_2(%arg0: i32, %arg1: i32, %arg2: i32) -> (i32, i32) {
    %c0_i32 = arith.constant 0 : i32
    %c0_i32_0 = arith.constant 0 : i32
    return %c0_i32, %arg1 : i32, i32
  }
  func.func @transform_3(%arg0: i32, %arg1: i32, %arg2: i32) -> (i32, i32) {
    %c0_i32 = arith.constant 0 : i32
    return %arg0, %arg1 : i32, i32
  }
}

</mosaic_0001>

<bundles_post_ra>
// kernel: linear_reshaped_pallas.1
= control target key start
LH: loop header
LB: loop body
LE: loop exit
PB: predicated region body
PF: predicated region fallthrough
CT: control target
= control target key end

     0   :  { %s495_s12 = smov 0   ;;  %s497_s13 = smov 0   ;;  %s583_s0 = inlined_call_operand.vmem [shape: f32[16,128], index: 0, kind: input, shape index: {}]   ;;  %s584_s1 = inlined_call_operand.vmem [shape: f32[128,128], index: 1, kind: input, shape index: {}]   ;;  %s585_s2 = inlined_call_operand.vmem [shape: f32[1,128], index: 2, kind: input, shape index: {}]   ;;  %s586_s3 = inlined_call_operand.vmem [shape: f32[16,128], index: 3, kind: output, shape index: {}]  }
   0x1   :  { %s499_s14 = smov 0  }
   0x2 LB: > { %s32_s15 = sadd.s32 1, %s469_s13  ;;  %p420_p0 = scmp.ge.s32.totalorder %s473_s14, 1  ;;  %s473_s14 = sphi %s499_s14, %s13_s14   ;;  %s469_s13 = sphi %s497_s13, %s588_s13   ;;  %s465_s12 = sphi %s495_s12, %s587_s12  }
   0x3   : > { %p34_p1 = scmp.ge.s32.totalorder %s32_s15, 2  ;;  %p186_p2 = scmp.lt.s32.totalorder %s473_s14, 3 }
   0x5   : > { %s590_s15 = smov (%p34_p1, %s32_s15), 0  ;;  %p187_p3 = pnand %p420_p0, %p186_p2 }
   0x6   : > { %p225_p4 = scmp.lt.s32.totalorder (!%p187_p3), %s465_s12, 1 }
   0x7   : > { %190 = sbr.rel (%p187_p3) target bundleno = 205 (0xcd), region = 32 }
   0xc   : > { %v273_v0 = vld [vmem:[%s584_s1 + $0x78] sm:$0xff]  ;;  %v272_v1 = vld [vmem:[%s584_s1 + $0x70] sm:$0xff]  ;;  %v271_v2 = vld [vmem:[%s584_s1 + $0x68] sm:$0xff]  ;;  %s592_s12 = smov (!%p225_p4, %s465_s12), 1 }
   0xd   : > { %274 = vmatpush.xpose.msra.mxu0 %v273_v0  ;;  %v270_v3 = vld [vmem:[%s584_s1 + $0x60] sm:$0xff]  ;;  %v269_v4 = vld [vmem:[%s584_s1 + $0x58] sm:$0xff]  ;;  %v268_v5 = vld [vmem:[%s584_s1 + $0x50] sm:$0xff]  ;;  %s421_s23 = sshll.u32 %s592_s12, 3 }
   0xe   : > { %v267_v6 = vld [vmem:[%s584_s1 + $0x48] sm:$0xff]  ;;  %v266_v7 = vld [vmem:[%s584_s1 + $0x40] sm:$0xff]  ;;  %v265_v8 = vld [vmem:[%s584_s1 + $0x38] sm:$0xff]  ;;  %s231_s28 = scalar_lea.vmem %s583_s0, %s421_s23  ;;  %s250_s12 = scalar_lea.vmem %s586_s3, %s421_s23 }
   0xf   : > { %v264_v9 = vld [vmem:[%s584_s1 + $0x30] sm:$0xff]  ;;  %v263_v10 = vld [vmem:[%s584_s1 + $0x28] sm:$0xff]  ;;  %v262_v11 = vld [vmem:[%s584_s1 + $0x20] sm:$0xff] }
  0x10   : > { %v261_v12 = vld [vmem:[%s584_s1 + $0x18] sm:$0xff]  ;;  %v260_v13 = vld [vmem:[%s584_s1 + $0x10] sm:$0xff]  ;;  %v259_v14 = vld [vmem:[%s584_s1 + $0x8] sm:$0xff] }
  0x11   : > { %275 = vmatpush.xpose.msra.mxu0 %v272_v1  ;;  %v258_v15 = vld [vmem:[%s584_s1] sm:$0xff] }
  0x12   : > { %v257_v16 = vld [vmem:[%s231_s28] sm:$0xff] }
  0x13   : > { %v450_v17 = vld [vmem:[%s585_s2] ss:$0 sm:$0xff] }
  0x15   : > { %276 = vmatpush.xpose.msra.mxu0 %v271_v2 }
  0x19   : > { %277 = vmatpush.xpose.msra.mxu0 %v270_v3 }
  0x1d   : > { %278 = vmatpush.xpose.msra.mxu0 %v269_v4 }
  0x21   : > { %279 = vmatpush.xpose.msra.mxu0 %v268_v5 }
  0x25   : > { %280 = vmatpush.xpose.msra.mxu0 %v267_v6 }
  0x29   : > { %281 = vmatpush.xpose.msra.mxu0 %v266_v7 }
  0x2d   : > { %282 = vmatpush.xpose.msra.mxu0 %v265_v8 }
  0x31   : > { %283 = vmatpush.xpose.msra.mxu0 %v264_v9 }
  0x35   : > { %284 = vmatpush.xpose.msra.mxu0 %v263_v10 }
  0x39   : > { %285 = vmatpush.xpose.msra.mxu0 %v262_v11 }
  0x3d   : > { %286 = vmatpush.xpose.msra.mxu0 %v261_v12 }
  0x41   : > { %287 = vmatpush.xpose.msra.mxu0 %v260_v13 }
  0x45   : > { %288 = vmatpush.xpose.msra.mxu0 %v259_v14 }
  0x49   : > { %289 = vmatpush.xpose.msra.mxu0 %v258_v15 }
  0x4c   : > { %290 = vmatmul.f32.vlgmr.msra.gmra.mxu0 %v257_v16 }
  0xc9   : > { %v291_v18 = vpop.f32.mrf.mxu0 }
  0xca   : > { %v304_v19 = vadd.f32 %v450_v17, %v291_v18 }
  0xcc   : > { %305 = vst [vmem:[%s250_s12] sm:$0xff] %v304_v19 }
  0xcd PF: > { %s13_s14 = sadd.s32 1, %s473_s14   ;;  %s587_s12 = smov %s469_s13 }
  0xce   : > { %p10_p5 = scmp.ge.s32.totalorder %s13_s14, 4   ;;  %s588_s13 = smov %s590_s15 }
  0xd0   :  { %12 = sbr.rel (!%p10_p5) target bundleno = 2 (0x2), region = 76 }

</bundles_post_ra>
